<compile_context>
chip_gen: v7x
topology: tpu7x:2x2x1
jax: 0.10.0
libtpu: 0.0.40
codegen_flags: <defaults>
</compile_context>

<pallas_src>
import jax
import jax.numpy as jnp
from jax.experimental import pallas as pl
from jax.experimental.pallas import tpu as pltpu


def _identity_kernel(x_ref, o_ref):
    # DummyLoss hot path: pure pass-through of x.
    # NOTE: if the grid's last block is partial, the out-of-bounds lanes read
    # garbage but their writeback is masked — safe ONLY for an identity copy.
    o_ref[...] = x_ref[...]


def _sublane_multiple(dtype):
    itemsize = jnp.dtype(dtype).itemsize
    if itemsize == 1:
        return 32
    if itemsize == 2:
        return 16
    return 8


def dummy_loss_forward(x, y=None, *, use_kernel=False,
                       lanes=1024, target_block_bytes=4 * 1024 * 1024):
    """Pallas implementation of DummyLoss.forward(x, y) == x.

    use_kernel=False (default) is the recommended production path: a true
    zero-work identity (no kernel launch, no HBM read+write).  use_kernel=True
    launches the lane-dense copy kernel for demonstration.
    """
    del y  # y never influences the output; do not DMA it anywhere.

    x = jnp.asarray(x)
    if not use_kernel:
        return x

    orig_shape = x.shape
    dtype = x.dtype
    n = x.size
    if n == 0:
        # Degenerate shape: nothing to copy, avoid zero-sized blocks.
        return x

    itemsize = jnp.dtype(dtype).itemsize
    sub = _sublane_multiple(dtype)

    # Pick a lane width (multiple of 128) that divides n exactly so the
    # wrapper never has to pad or slice (no extra HBM copies).
    c = 0
    for cand in (lanes, 1024, 512, 256, 128):
        if cand % 128 == 0 and n % cand == 0:
            c = cand
            break

    if c == 0:
        # n is not a multiple of 128: use one full-extent block (block shape
        # equal to the full array dims is exempt from the (8,128) rule).
        x2 = x.reshape(1, n)
        out2 = pl.pallas_call(
            _identity_kernel,
            out_shape=jax.ShapeDtypeStruct((1, n), dtype),
        )(x2)
        return out2.reshape(orig_shape)

    rows = n // c
    x2 = x.reshape(rows, c)

    if rows <= sub:
        # Tiny input: single full-extent block (exempt from (8,128) rule).
        out2 = pl.pallas_call(
            _identity_kernel,
            out_shape=jax.ShapeDtypeStruct((rows, c), dtype),
        )(x2)
        return out2.reshape(orig_shape)

    # Rows per block: bounded only by the per-block VMEM budget, rounded to
    # the dtype's sublane packing multiple.  No artificial rows/2 cap, so
    # large inputs get a deep grid (>= 4-8 steps) that pipelines and spreads
    # across both v7x TensorCores.
    max_rows_per_block = max(sub, (target_block_bytes // (c * itemsize)) // sub * sub)
    tile_rows = min(max_rows_per_block, (rows // sub) * sub)

    grid_rows = pl.cdiv(rows, tile_rows)

    out2 = pl.pallas_call(
        _identity_kernel,
        out_shape=jax.ShapeDtypeStruct((rows, c), dtype),
        grid_spec=pltpu.PrefetchScalarGridSpec(
            num_scalar_prefetch=0,
            grid=(grid_rows,),
            in_specs=[pl.BlockSpec((tile_rows, c), lambda i: (i, 0))],
            out_specs=pl.BlockSpec((tile_rows, c), lambda i: (i, 0)),
        ),
        compiler_params=pltpu.CompilerParams(
            dimension_semantics=("parallel",),
            vmem_limit_bytes=32 * 1024 * 1024,
        ),
    )(x2)

    return out2.reshape(orig_shape)


if __name__ == "__main__":
    key = jax.random.PRNGKey(0)
    kx, ky, kb = jax.random.split(key, 3)

    # Small shapes consistent with a loss module: x = model outputs / logits,
    # y = integer targets.  (DummyLoss has no parameters.)
    x = jax.random.normal(kx, (2, 4, 16, 16), dtype=jnp.float32)
    y = jax.random.randint(ky, (2,), 0, 4).astype(jnp.int32)

    out = dummy_loss_forward(x, y, use_kernel=True)
    out = jax.block_until_ready(out)
    assert out.shape == x.shape and out.dtype == x.dtype
    assert bool(jnp.all(out == x))

    # bf16 input exercises the sub-32-bit sublane-multiple handling.
    xb = jax.random.normal(kb, (2, 8, 64), dtype=jnp.bfloat16)
    outb = jax.block_until_ready(dummy_loss_forward(xb, y, use_kernel=True))
    assert outb.shape == xb.shape and outb.dtype == xb.dtype
    assert bool(jnp.all(outb == xb))

    # Zero-work short-circuit (production default) must match too.
    out_fast = jax.block_until_ready(dummy_loss_forward(x, y, use_kernel=False))
    assert bool(jnp.all(out_fast == x))

    print("KERNEL_OK")
</pallas_src>

<mosaic_0001>
module attributes {stable_mosaic.version = 11 : i64} {
  func.func @_identity_kernel(%arg0: memref<2x1024xf32, #tpu.memory_space<vmem>>, %arg1: memref<2x1024xf32, #tpu.memory_space<vmem>>) attributes {dimension_semantics = [], scalar_prefetch = 0 : i64, scratch_operands = 0 : i64, tpu.core_type = #tpu.core_type<tc>} {
    %c0 = arith.constant 0 : index
    %c0_0 = arith.constant 0 : index
    %0 = vector.load %arg0[%c0, %c0_0] : memref<2x1024xf32, #tpu.memory_space<vmem>>, vector<2x1024xf32>
    %c0_1 = arith.constant 0 : index
    %c0_2 = arith.constant 0 : index
    %1 = vector.load %arg1[%c0_1, %c0_2] : memref<2x1024xf32, #tpu.memory_space<vmem>>, vector<2x1024xf32>
    tpu.vector_store %arg1[%c0_1, %c0_2], %0 {strides = array<i32>} : memref<2x1024xf32, #tpu.memory_space<vmem>>, vector<2x1024xf32>,
    return
  }
}

</mosaic_0001>

<bundles_post_ra>
// kernel: tpu_custom_call.1
= control target key start
LH: loop header
LB: loop body
LE: loop exit
PB: predicated region body
PF: predicated region fallthrough
CT: control target
= control target key end

     0   :  { %6 = vsyncpa [#allocation3], 0  ;;  %s126_s0 = inlined_call_operand.hbm [shape: f32[2,1024], index: 0, kind: input, shape index: {}]   ;;  %s127_s1 = inlined_call_operand.hbm [shape: f32[2,1024], index: 1, kind: output, shape index: {}]  }
   0x1   :  { %7 = vsyncpa [#allocation4], 0  ;;  %s90_s6 = smov [#allocation2]   ;;  %s42_s10 = scalar_lea.hbm %s126_s0, 256 }
   0x2   :  { %s14_s7 = sshll.u32 %s90_s6, 4  ;;  %p43_p0 = scmp.ne.s32.totalorder %s126_s0, %s42_s10  ;;  %s15_s7 = int_to_ptr.vmem [resolvable:$true] %s14_s7 }
   0x3   :  { %p46_p1 = scmp.lt.u32.totalorder %s42_s10, %s126_s0 }
   0x5   :  { %p48_p2 = pnand %p46_p1, %p43_p0 }
   0x7   :  { %51 = shalt.err (!%p48_p2)
}
   0x8   :  { %s52_s15 = scalar_lea.vmem %s15_s7, 256  ;;  %p57_p4 = scmp.lt.s32.totalorder %s15_s7, %s15_s7 }
   0x9   :  { %p53_p3 = scmp.ne.s32.totalorder %s15_s7, %s52_s15  ;;  %p58_p5 = scmp.lt.s32.totalorder %s52_s15, %s52_s15 }
   0xb   :  { %p59_p6 = por %p58_p5, %p57_p4 }
   0xd   :  { %p60_p7 = pnand %p59_p6, %p53_p3 }
   0xf   :  { %63 = shalt.err (!%p60_p7)
}
  0x10   :  { %17 = dma.hbm_to_vmem [thread:$0]  %s126_s0, 256, %s15_s7, [#allocation3]  }
  0x11   :  { %86 = dma.done.wait [#allocation3], 256  }
  0x12   :  { %87 = vsyncadd [#allocation3], 4294967040  ;;  %s91_s18 = smov [#allocation5]   ;;  %v21_v0 = vld [vmem:[#allocation2] sm:$0xff]  ;;  %v22_v1 = vld [vmem:[#allocation2 + $0x8] sm:$0xff] }
  0x13   :  { %s31_s19 = sshll.u32 %s91_s18, 4  ;;  %23 = vst [vmem:[#allocation5] sm:$0xff] %v21_v0  ;;  %24 = vst [vmem:[#allocation5 + $0x8] sm:$0xff] %v22_v1  ;;  %s32_s19 = int_to_ptr.vmem [resolvable:$true] %s31_s19 }
  0x14   :  { %s64_s20 = scalar_lea.vmem %s32_s19, 256  ;;  %p69_p9 = scmp.lt.s32.totalorder %s32_s19, %s32_s19 }
  0x15   :  { %p65_p8 = scmp.ne.s32.totalorder %s32_s19, %s64_s20  ;;  %p70_p10 = scmp.lt.s32.totalorder %s64_s20, %s64_s20 }
  0x17   :  { %p71_p11 = por %p70_p10, %p69_p9 }
  0x19   :  { %p72_p12 = pnand %p71_p11, %p65_p8 }
  0x1b   :  { %75 = shalt.err (!%p72_p12)
}
  0x1c   :  { %s76_s0 = scalar_lea.hbm %s127_s1, 256 }
  0x1d   :  { %p77_p13 = scmp.ne.s32.totalorder %s127_s1, %s76_s0  ;;  %p80_p0 = scmp.lt.u32.totalorder %s76_s0, %s127_s1 }
  0x1f   :  { %p82_p1 = pnand %p80_p0, %p77_p13 }
  0x21   :  { %85 = shalt.err (!%p82_p1)
}
  0x22   :  { %34 = dma.vmem_to_hbm [thread:$0]  %s32_s19, 256, %s127_s1, [#allocation4]  }
  0x23   :  { %88 = dma.done.wait [#allocation4], 256  }
  0x24   :  { %89 = vsyncadd [#allocation4], 4294967040 }
  0x25   :  { %38 = vsyncpa [#allocation3], 1 }
  0x26   :  { %39 = vsyncpa [#allocation4], 1 }

</bundles_post_ra>
